<compile_context>
chip_gen: v5e
topology: v5e:2x2
jax: 0.10.0
libtpu: 0.0.40
codegen_flags: <defaults>
</compile_context>

<pallas_src>
import jax
import jax.numpy as jnp
import numpy as np
from jax.experimental import pallas as pl
from jax.experimental.pallas import tpu as pltpu


def _round_up(x, m):
    return ((x + m - 1) // m) * m


def _vmem_capacity_bytes():
    try:
        return int(pltpu.get_tpu_info().vmem_capacity_bytes)
    except Exception:
        return 64 * 1024 * 1024  # conservative fallback (v7x per-TC VMEM)


def _block_vmem_bytes(th, wpad, cin, cout_pad, itemsize):
    """Estimated VMEM footprint of one pipeline step (double-buffered operands)."""
    rb = (th + 3) * wpad          # input rows per block (halo + slack included)
    mb = th * wpad                # output rows per block
    ncat = (th + 2) * wpad        # rows of the in-kernel kx-window concat
    b = 0
    b += 2 * rb * cin * itemsize                   # input block  (x2 pipeline buffers)
    b += 2 * 3 * (3 * cin) * cout_pad * itemsize   # weights (constant index, still x2)
    b += 2 * mb * cout_pad * itemsize              # output block (x2 pipeline buffers)
    b += mb * cout_pad * 4                         # f32 accumulator scratch
    b += ncat * 3 * cin * itemsize                 # xcat temp
    return b


def _choose_tile_h(ho, wpad, cin, cout_pad, itemsize, budget):
    """Largest H-tile that fits the VMEM budget, capped so there are >= 2 pipeline steps."""
    th = max(1, min(ho, 512))
    while th > 1 and _block_vmem_bytes(th, wpad, cin, cout_pad, itemsize) > budget:
        th -= 1
    if ho >= 2:
        th = min(th, -(-ho // 2))   # at least 2 H-blocks -> pipelining + megacore load balance
    return th


def _make_kernel(mb, wpad, ncat):
    """Fused 3x3 conv over one (batch, H-block): 3 MXU matmuls with K = 3*Cin."""

    def kernel(x_ref, w_ref, o_ref, acc_ref):
        # x_ref:   [1, 1, RB, Cin]        flattened zero-padded pooled rows (+halo/slack)
        # w_ref:   [3, 3*Cin, Cout_pad]   per-ky weight slabs (0.25 average folded in)
        # o_ref:   [1, 1, MB, Cout_pad]   MB = TH * Wpad "full width" output rows
        # acc_ref: VMEM [MB, Cout_pad] f32 accumulator
        x = x_ref[0, 0]                                              # [RB, Cin]
        # kx taps folded into K: xcat[r] = [x[r], x[r+1], x[r+2]] built once per block
        # (one aligned + two sublane-shifted copies instead of nine misaligned slices).
        xcat = jnp.concatenate(
            [x[0:ncat, :], x[1:ncat + 1, :], x[2:ncat + 2, :]], axis=-1)   # [NCAT, 3*Cin]
        # ky taps: sublane-aligned row shifts (Wpad % 8 == 0), one MXU matmul each.
        acc_ref[...] = jnp.dot(xcat[0:mb], w_ref[0],
                               preferred_element_type=jnp.float32)
        acc_ref[...] += jnp.dot(xcat[wpad:wpad + mb], w_ref[1],
                                preferred_element_type=jnp.float32)
        acc_ref[...] += jnp.dot(xcat[2 * wpad:2 * wpad + mb], w_ref[2],
                                preferred_element_type=jnp.float32)
        o_ref[0, 0] = acc_ref[...].astype(o_ref.dtype)

    return kernel


def downsample_conv2d(x, weight, compute_dtype=None):
    """x: [B, Cin, H, W] (NCHW), weight: [Cout, Cin, 3, 3] -> [B, Cout, H//2, W//2].

    compute_dtype: MXU operand dtype (defaults to x.dtype; pass jnp.bfloat16 for peak MXU).
    """
    B, Cin, H, W = x.shape
    Cout = weight.shape[0]
    Ho, Wo = H // 2, W // 2
    out_dtype = x.dtype
    cdt = jnp.dtype(out_dtype if compute_dtype is None else compute_dtype)
    isz = cdt.itemsize
    osz = jnp.dtype(out_dtype).itemsize

    cout_pad = _round_up(Cout, 128)        # lane-dense output / MXU N dimension
    Wpad = _round_up(Wo + 2, 8)            # padded row width, sublane-aligned

    cap = _vmem_capacity_bytes()
    budget = min(int(cap * 0.55), 96 * 1024 * 1024)
    TH = _choose_tile_h(Ho, Wpad, Cin, cout_pad, isz, budget)
    NH = -(-Ho // TH)
    Ho_pad = NH * TH
    RB = (TH + 3) * Wpad                   # input rows per block (TH + 2 halo + 1 slack rows)
    MB = TH * Wpad                         # output rows per block (incl. garbage columns)
    NCAT = (TH + 2) * Wpad                 # rows of the in-kernel kx concat

    # --- wrapper glue: pool first (NCHW, f32 sum), then transpose/pad the 4x smaller tensor ---
    x32 = x.astype(jnp.float32)
    pooled = (x32[:, :, 0::2, 0::2] + x32[:, :, 0::2, 1::2]
              + x32[:, :, 1::2, 0::2] + x32[:, :, 1::2, 1::2])        # [B, Cin, Ho, Wo] (sum; /4 in W)
    pooled = jnp.transpose(pooled, (0, 2, 3, 1)).astype(cdt)          # [B, Ho, Wo, Cin]
    xp = jnp.pad(pooled, ((0, 0), (1, Ho_pad + 2 - Ho), (1, Wpad - 1 - Wo), (0, 0)))
    # xp: [B, Ho_pad + 3, Wpad, Cin]; per-H-block overlapping windows (2-row halo + 1 slack):
    xblk = jnp.stack([xp[:, hb * TH: hb * TH + TH + 3] for hb in range(NH)], axis=1)
    xblk = xblk.reshape(B, NH, RB, Cin)

    # nn.Conv2d weight [Cout, Cin, 3, 3] -> [3(ky), 3*Cin (kx-major), Cout_pad]; 0.25 folded in.
    wt = 0.25 * jnp.transpose(weight.astype(jnp.float32), (2, 3, 1, 0))   # [3, 3, Cin, Cout]
    wt = wt.reshape(3, 3 * Cin, Cout)
    wt = jnp.pad(wt, ((0, 0), (0, 0), (0, cout_pad - Cout))).astype(cdt)

    flops = 2 * B * NH * MB * (3 * Cin) * cout_pad * 3
    bytes_accessed = (xblk.size * isz) + (wt.size * isz) + (B * NH * MB * cout_pad * osz)
    cost = pl.CostEstimate(flops=flops, transcendentals=0, bytes_accessed=bytes_accessed)

    vmem_limit = int(min(cap * 0.9,
                         max(_block_vmem_bytes(TH, Wpad, Cin, cout_pad, isz) * 1.3 + (4 << 20),
                             32 << 20)))

    kernel = _make_kernel(MB, Wpad, NCAT)

    # TODO(synk): single-buffer the constant-index weight operand (pipeline_mode=pl.Buffered(1))
    # once verified on this JAX version; it reclaims one weight buffer of VMEM on v7x.
    out_blk = pl.pallas_call(
        kernel,
        out_shape=jax.ShapeDtypeStruct((B, NH, MB, cout_pad), out_dtype),
        grid=(B, NH),
        in_specs=[
            pl.BlockSpec((1, 1, RB, Cin), lambda b, hb: (b, hb, 0, 0)),
            pl.BlockSpec((3, 3 * Cin, cout_pad), lambda b, hb: (0, 0, 0)),  # VMEM-resident
        ],
        out_specs=pl.BlockSpec((1, 1, MB, cout_pad), lambda b, hb: (b, hb, 0, 0)),
        scratch_shapes=[pltpu.VMEM((MB, cout_pad), jnp.float32)],
        compiler_params=pltpu.CompilerParams(
            dimension_semantics=("parallel", "parallel"),
            vmem_limit_bytes=vmem_limit,
        ),
        cost_estimate=cost,
    )(xblk, wt)

    # Drop garbage columns / padded rows / lane padding; return NCHW like PyTorch.
    # TODO(synk): when Cout << 128, pack several output rows per 128-lane group (or return
    # channels-last) to avoid writing the padded lanes to HBM and the final transpose pass.
    out = out_blk.reshape(B, NH * TH, Wpad, cout_pad)[:, :Ho, :Wo, :Cout]
    return jnp.transpose(out, (0, 3, 1, 2))


def _reference(x, weight):
    """Pure-JAX reference: avgpool2x2 then 3x3 conv (padding=1, no bias), NCHW."""
    B, Cin, H, W = x.shape
    pooled = x.reshape(B, Cin, H // 2, 2, W // 2, 2).mean(axis=(3, 5))
    return jax.lax.conv_general_dilated(
        pooled, weight, window_strides=(1, 1), padding=((1, 1), (1, 1)),
        dimension_numbers=("NCHW", "OIHW", "NCHW"))


if __name__ == "__main__":
    key = jax.random.PRNGKey(0)
    k_x, k_w = jax.random.split(key)
    B, in_dim, out_dim, H, W = 2, 4, 8, 16, 16

    x = jax.random.normal(k_x, (B, in_dim, H, W), dtype=jnp.float32)
    # Deterministic synthetic weight for nn.Conv2d(in_dim, out_dim, (3,3), bias=False):
    weight = jax.random.normal(k_w, (out_dim, in_dim, 3, 3), dtype=jnp.float32) * 0.1

    out = downsample_conv2d(x, weight)
    out = jax.block_until_ready(out)

    ref = _reference(x, weight)
    np.testing.assert_allclose(np.asarray(out), np.asarray(ref), rtol=1e-4, atol=1e-4)
    assert out.shape == (B, out_dim, H // 2, W // 2)
    print("KERNEL_OK")
</pallas_src>

<mosaic_0001>
module attributes {stable_mosaic.version = 11 : i64} {
  func.func @kernel(%arg0: i32, %arg1: i32, %arg2: memref<1x1x112x4xf32, #tpu.memory_space<vmem>>, %arg3: memref<3x12x128xf32, #tpu.memory_space<vmem>>, %arg4: memref<1x1x64x128xf32, #tpu.memory_space<vmem>>, %arg5: memref<64x128xf32, #tpu.memory_space<vmem>>) attributes {dimension_semantics = [#tpu.dimension_semantics<parallel>, #tpu.dimension_semantics<parallel>], iteration_bounds = array<i64: 2, 2>, scalar_prefetch = 0 : i64, scratch_operands = 1 : i64, tpu.core_type = #tpu.core_type<tc>, window_params = [{transform_indices = @transform_0, window_bounds = array<i64: 1, 1, 112, 4>}, {pipeline_mode = #tpu.pipeline_mode<synchronous>, transform_indices = @transform_1, window_bounds = array<i64: 3, 12, 128>}, {transform_indices = @transform_2, window_bounds = array<i64: 1, 1, 64, 128>}]} {
    %c0 = arith.constant 0 : index
    %c0_0 = arith.constant 0 : index
    %c0_1 = arith.constant 0 : index
    %c0_2 = arith.constant 0 : index
    %0 = vector.load %arg2[%c0, %c0_0, %c0_1, %c0_2] : memref<1x1x112x4xf32, #tpu.memory_space<vmem>>, vector<1x1x112x4xf32>
    %1 = vector.shape_cast %0 : vector<1x1x112x4xf32> to vector<112x4xf32>
    %2 = vector.extract_strided_slice %1 {offsets = [0, 0], sizes = [96, 4], strides = [1, 1]} : vector<112x4xf32> to vector<96x4xf32>
    %3 = vector.extract_strided_slice %1 {offsets = [1, 0], sizes = [96, 4], strides = [1, 1]} : vector<112x4xf32> to vector<96x4xf32>
    %4 = vector.extract_strided_slice %1 {offsets = [2, 0], sizes = [96, 4], strides = [1, 1]} : vector<112x4xf32> to vector<96x4xf32>
    %5 = tpu.concatenate %2, %3, %4 in 1 : vector<96x4xf32>, vector<96x4xf32>, vector<96x4xf32> -> vector<96x12xf32>
    %6 = vector.extract_strided_slice %5 {offsets = [0, 0], sizes = [64, 12], strides = [1, 1]} : vector<96x12xf32> to vector<64x12xf32>
    %c0_3 = arith.constant 0 : index
    %c0_4 = arith.constant 0 : index
    %c0_5 = arith.constant 0 : index
    %7 = vector.load %arg3[%c0_3, %c0_4, %c0_5] : memref<3x12x128xf32, #tpu.memory_space<vmem>>, vector<1x12x128xf32>
    %8 = vector.shape_cast %7 : vector<1x12x128xf32> to vector<12x128xf32>
    %cst = arith.constant dense<0.000000e+00> : vector<64x128xf32>
    %9 = tpu.matmul %6, %8, %cst {dimension_numbers = #tpu.dot_dimension_numbers<[1], [0], [0], [1], [0, 0, 1, 1], [], []>} : vector<64x12xf32>, vector<12x128xf32>, vector<64x128xf32> -> vector<64x128xf32>
    %c0_6 = arith.constant 0 : index
    %c0_7 = arith.constant 0 : index
    %10 = vector.load %arg5[%c0_6, %c0_7] : memref<64x128xf32, #tpu.memory_space<vmem>>, vector<64x128xf32>
    tpu.vector_store %arg5[%c0_6, %c0_7], %9 {strides = array<i32>} : memref<64x128xf32, #tpu.memory_space<vmem>>, vector<64x128xf32>,
    %c0_8 = arith.constant 0 : index
    %c0_9 = arith.constant 0 : index
    %11 = vector.load %arg5[%c0_8, %c0_9] : memref<64x128xf32, #tpu.memory_space<vmem>>, vector<64x128xf32>
    %12 = vector.extract_strided_slice %5 {offsets = [16, 0], sizes = [64, 12], strides = [1, 1]} : vector<96x12xf32> to vector<64x12xf32>
    %c1 = arith.constant 1 : index
    %c0_10 = arith.constant 0 : index
    %c0_11 = arith.constant 0 : index
    %13 = vector.load %arg3[%c1, %c0_10, %c0_11] : memref<3x12x128xf32, #tpu.memory_space<vmem>>, vector<1x12x128xf32>
    %14 = vector.shape_cast %13 : vector<1x12x128xf32> to vector<12x128xf32>
    %cst_12 = arith.constant dense<0.000000e+00> : vector<64x128xf32>
    %15 = tpu.matmul %12, %14, %cst_12 {dimension_numbers = #tpu.dot_dimension_numbers<[1], [0], [0], [1], [0, 0, 1, 1], [], []>} : vector<64x12xf32>, vector<12x128xf32>, vector<64x128xf32> -> vector<64x128xf32>
    %16 = arith.addf %11, %15 : vector<64x128xf32>
    %c0_13 = arith.constant 0 : index
    %c0_14 = arith.constant 0 : index
    %17 = vector.load %arg5[%c0_13, %c0_14] : memref<64x128xf32, #tpu.memory_space<vmem>>, vector<64x128xf32>
    tpu.vector_store %arg5[%c0_13, %c0_14], %16 {strides = array<i32>} : memref<64x128xf32, #tpu.memory_space<vmem>>, vector<64x128xf32>,
    %c0_15 = arith.constant 0 : index
    %c0_16 = arith.constant 0 : index
    %18 = vector.load %arg5[%c0_15, %c0_16] : memref<64x128xf32, #tpu.memory_space<vmem>>, vector<64x128xf32>
    %19 = vector.extract_strided_slice %5 {offsets = [32, 0], sizes = [64, 12], strides = [1, 1]} : vector<96x12xf32> to vector<64x12xf32>
    %c2 = arith.constant 2 : index
    %c0_17 = arith.constant 0 : index
    %c0_18 = arith.constant 0 : index
    %20 = vector.load %arg3[%c2, %c0_17, %c0_18] : memref<3x12x128xf32, #tpu.memory_space<vmem>>, vector<1x12x128xf32>
    %21 = vector.shape_cast %20 : vector<1x12x128xf32> to vector<12x128xf32>
    %cst_19 = arith.constant dense<0.000000e+00> : vector<64x128xf32>
    %22 = tpu.matmul %19, %21, %cst_19 {dimension_numbers = #tpu.dot_dimension_numbers<[1], [0], [0], [1], [0, 0, 1, 1], [], []>} : vector<64x12xf32>, vector<12x128xf32>, vector<64x128xf32> -> vector<64x128xf32>
    %23 = arith.addf %18, %22 : vector<64x128xf32>
    %c0_20 = arith.constant 0 : index
    %c0_21 = arith.constant 0 : index
    %24 = vector.load %arg5[%c0_20, %c0_21] : memref<64x128xf32, #tpu.memory_space<vmem>>, vector<64x128xf32>
    tpu.vector_store %arg5[%c0_20, %c0_21], %23 {strides = array<i32>} : memref<64x128xf32, #tpu.memory_space<vmem>>, vector<64x128xf32>,
    %c0_22 = arith.constant 0 : index
    %c0_23 = arith.constant 0 : index
    %25 = vector.load %arg5[%c0_22, %c0_23] : memref<64x128xf32, #tpu.memory_space<vmem>>, vector<64x128xf32>
    %c0_24 = arith.constant 0 : index
    %c0_25 = arith.constant 0 : index
    %c0_26 = arith.constant 0 : index
    %c0_27 = arith.constant 0 : index
    %26 = vector.load %arg4[%c0_24, %c0_25, %c0_26, %c0_27] : memref<1x1x64x128xf32, #tpu.memory_space<vmem>>, vector<1x1x64x128xf32>
    %27 = vector.shape_cast %26 : vector<1x1x64x128xf32> to vector<64x128xf32>
    %28 = vector.shape_cast %25 : vector<64x128xf32> to vector<1x1x64x128xf32>
    tpu.vector_store %arg4[%c0_24, %c0_25, %c0_26, %c0_27], %28 {strides = array<i32>} : memref<1x1x64x128xf32, #tpu.memory_space<vmem>>, vector<1x1x64x128xf32>,
    return
  }
  func.func @transform_0(%arg0: i32, %arg1: i32) -> (i32, i32, i32, i32) {
    %c0_i32 = arith.constant 0 : i32
    %c0_i32_0 = arith.constant 0 : i32
    %c0_i32_1 = arith.constant 0 : i32
    return %arg0, %arg1, %c0_i32, %c0_i32_0 : i32, i32, i32, i32
  }
  func.func @transform_1(%arg0: i32, %arg1: i32) -> (i32, i32, i32) {
    %c0_i32 = arith.constant 0 : i32
    %c0_i32_0 = arith.constant 0 : i32
    %c0_i32_1 = arith.constant 0 : i32
    %c0_i32_2 = arith.constant 0 : i32
    return %c0_i32, %c0_i32_0, %c0_i32_1 : i32, i32, i32
  }
  func.func @transform_2(%arg0: i32, %arg1: i32) -> (i32, i32, i32, i32) {
    %c0_i32 = arith.constant 0 : i32
    %c0_i32_0 = arith.constant 0 : i32
    %c0_i32_1 = arith.constant 0 : i32
    return %arg0, %arg1, %c0_i32, %c0_i32_0 : i32, i32, i32, i32
  }
}

</mosaic_0001>

<bundles_post_ra>
// kernel: tpu_custom_call.1
= control target key start
LH: loop header
LB: loop body
LE: loop exit
PB: predicated region body
PF: predicated region fallthrough
CT: control target
= control target key end

     0   :  { %7 = vsyncpa [#allocation4], 0  ;;  %s1285_s0 = inlined_call_operand.vmem [shape: f32[2,2,112,4], index: 0, kind: input, shape index: {}]   ;;  %s1286_s1 = inlined_call_operand.vmem [shape: f32[3,12,128], index: 1, kind: input, shape index: {}]   ;;  %s1287_s2 = inlined_call_operand.hbm [shape: f32[2,2,64,128], index: 2, kind: output, shape index: {}]  }
   0x1   :  { %9 = vsyncpa [#allocation4 + $0x1], 0  ;;  %s939_s9 = smov 0   ;;  %s941_s10 = smov 0  }
   0x2   :  { %s943_s11 = smov 0   ;;  %s945_s12 = smov 0  }
   0x3   :  { %s947_s13 = smov 0   ;;  %s949_s14 = smov 0  }
   0x4   :  { %s951_s15 = smov 0   ;;  %s953_s16 = smov 0  }
   0x5 LB: > { %s699_s17 = sadd.s32 4294967295, %s919_s16   ;;  %s700_s18 = sadd.s32 4294967294, %s919_s16   ;;  %s919_s16 = sphi %s953_s16, %s15_s16   ;;  %s915_s15 = sphi %s951_s15, %s1296_s15   ;;  %s911_s14 = sphi %s949_s14, %s1295_s14   ;;  %s907_s13 = sphi %s947_s13, %s1294_s13   ;;  %s903_s12 = sphi %s945_s12, %s1293_s12   ;;  %s899_s11 = sphi %s943_s11, %s1292_s11   ;;  %s895_s10 = sphi %s941_s10, %s1291_s10   ;;  %s891_s9 = sphi %s939_s9, %s1290_s9  }
   0x6   : > { %s24_s19 = sadd.s32 1, %s911_s14  ;;  %s27_s20 = sadd.s32 1, %s915_s15 }
   0x7   : > { %p25_p0 = scmp.ge.s32.totalorder %s24_s19, 2  ;;  %p95_p1 = scmp.ne.s32.totalorder %s899_s11, %s895_s10 }
   0x8   : > { %p96_p2 = scmp.eq.s32.totalorder %s699_s17, 3  ;;  %p101_p5 = scmp.ne.s32.totalorder %s895_s10, %s891_s9 }
   0x9   : > { %s1298_s19 = smov (%p25_p0, %s24_s19), 0  ;;  %s1300_s20 = smov (!%p25_p0, %s27_s20), %s915_s15 }
   0xa   : > { %s81_s21 = ssub.s32 %s911_s14, %s1298_s19  ;;  %p990_p3 = por %p96_p2, %p95_p1 }
   0xb   : > { %p29_p4 = scmp.ge.s32.totalorder %s1300_s20, 2  ;;  %p102_p6 = scmp.eq.s32.totalorder %s700_s18, 3 }
   0xc   : > { %p703_p7 = scmp.ge.s32.totalorder %s919_s16, 1  ;;  %p135_p9 = scmp.lt.s32.totalorder %s919_s16, 5 }
   0xd   : > { %s1302_s20 = smov (%p29_p4, %s1300_s20), 0  ;;  %p999_p8 = por %p102_p6, %p101_p5 }
   0xe   : > { %s80_s24 = ssub.s32 %s915_s15, %s1302_s20  ;;  %s85_s25 = sadd.s32 1, %s899_s11 }
   0xf   : > { %s82_s26 = sor.u32 %s81_s21, %s80_s24  ;;  %p136_p10 = pnand %p703_p7, %p135_p9 }
  0x10   : > { %p83_p11 = scmp.eq.s32.totalorder %s82_s26, 0  ;;  %p161_p12 = scmp.lt.s32.totalorder (!%p136_p10), %s907_s13, 1 }
  0x11   : > { %139 = sbr.rel (%p136_p10) target bundleno = 356 (0x164), region = 28  ;;  %p163_p13 = scmp.lt.s32.totalorder (!%p136_p10), %s903_s12, 1 }
  0x12   : > { %s1008_s27 = scalar_select %p83_p11, %s899_s11, %s85_s25  }
  0x13   : > { %s921_s17 = smov (!%p136_p10), 8   ;;  %s922_s18 = smov (!%p136_p10), 4  }
  0x14   : > { %s738_s24 = sshll.u32 (!%p136_p10), %s903_s12, 3  ;;  %s739_s25 = sshll.u32 (!%p136_p10), %s907_s13, 4 }
  0x15   : > { %s608_s26 = sadd.s32 (!%p136_p10), %s739_s25, %s738_s24  ;;  %s845_s24 = scalar_lea.hbm (!%p136_p10), %s1287_s2, 256 }
  0x16   : > { %s162_s28 = scalar_select %p161_p12, %s907_s13, 1  ;;  %vm258_vm0 = vcmask 1045504   ;;  %vm196_vm1 = vcmask 1046528   ;;  %vm373_vm2 = vcmask 1043456   ;;  %v1095_v41 = vld [vmem:[%s1286_s1 + $0x28] sm:$0xf] }
  0x17   : > { %s164_s29 = scalar_select %p163_p13, %s903_s12, 1  ;;  %728 = vmatpush.msk.msra.mxu2 %vm373_vm2, %v1095_v41  ;;  %vm320_vm3 = vcmask 31744   ;;  %vm333_vm4 = vcmask 64512   ;;  %vm348_vm5 = vcmask 97280  }
  0x18   : > { %s750_s30 = smul.u32 28, %s162_s28  ;;  %s740_s28 = sshll.u32 %s608_s26, 3 }
  0x19   : > { %s749_s3 = smul.u32 14, %s164_s29  ;;  %s610_s12 = scalar_lea.hbm %s1287_s2, %s740_s28 }
  0x1b   : > { %s167_s4 = sadd.s32 %s750_s30, %s749_s3  ;;  %s613_s3 = sshll.u32 %s610_s12, 4  ;;  %s614_s3 = int_to_ptr.hbm [resolvable:$true] %s613_s3 }
  0x1c   : > { %s705_s5 = sshll.u32 %s167_s4, 3 }
  0x1d   : > { %s1017_s8 = scalar_lea.vmem %s1285_s0, %s705_s5  ;;  %s839_s5 = sshra.s32 %s614_s3, 4  ;;  %s840_s5 = int_to_ptr.hbm [resolvable:$true] %s839_s5 }
  0x1e   : > { %v1020_v0 = vld [vmem:[%s1017_s8 + $0x20] sm:$0xff]  ;;  %v1023_v1 = vld [vmem:[%s1017_s8 + $0x28] sm:$0xff]  ;;  %v1030_v6 = vld [vmem:[%s1017_s8 + $0x30] sm:$0xff]  ;;  %s841_s6 = scalar_lea.hbm %s840_s5, 64  ;;  %p846_p4 = scmp.lt.s32.totalorder %s840_s5, %s1287_s2 }
  0x1f   : > { %v266_v2 = vrot.slane %v1020_v0, 2  ;;  %v268_v3 = vrot.slane %v1023_v1, 2  ;;  %v204_v4 = vrot.slane %v1020_v0, 1  ;;  %v206_v5 = vrot.slane %v1023_v1, 1  ;;  %v1033_v7 = vld [vmem:[%s1017_s8 + $0x38] sm:$0xff]  ;;  %v1043_v11 = vld [vmem:[%s1017_s8] sm:$0xff]  ;;  %p842_p0 = scmp.ne.s32.totalorder %s840_s5, %s841_s6  ;;  %p847_p5 = scmp.lt.s32.totalorder %s845_s24, %s841_s6 }
  0x20   : > { %v270_v10 = vrot.slane %v1030_v6, 2  ;;  %v272_v12 = vrot.slane %v1033_v7, 2  ;;  %v208_v13 = vrot.slane %v1030_v6, 1  ;;  %v210_v14 = vrot.slane %v1033_v7, 1  ;;  %v1049_v15 = vld [vmem:[%s1017_s8 + $0x8] sm:$0xff]  ;;  %v1057_v21 = vld [vmem:[%s1017_s8 + $0x10] sm:$0xff] }
  0x21   : > { %v269_v8 = vsel %vm258_vm0, %v266_v2, %v268_v3  ;;  %v207_v9 = vsel %vm196_vm1, %v204_v4, %v206_v5  ;;  %v197_v16 = vrot.slane %v1043_v11, 1  ;;  %v198_v17 = vrot.slane %v1049_v15, 1  ;;  %v1060_v22 = vld [vmem:[%s1017_s8 + $0x18] sm:$0xff]  ;;  %v1076_v32 = vld [vmem:[%s1017_s8 + $0x40] sm:$0xff]  ;;  %v1098_v42 = vld [vmem:[%s1017_s8 + $0x48] sm:$0xff]  ;;  %p843_p1 = pnand %p842_p0, %p990_p3  ;;  %p848_p6 = por %p847_p5, %p846_p4 }
  0x22   : > { %292 = vrot.lane.b32.xlu1 %v269_v8, %s921_s17  ;;  %230 = vrot.lane.b32.xlu0 %v207_v9, %s922_s18  ;;  %v273_v19 = vsel %vm258_vm0, %v270_v10, %v272_v12  ;;  %v211_v20 = vsel %vm196_vm1, %v208_v13, %v210_v14  ;;  %v202_v23 = vrot.slane %v1060_v22, 1  ;;  %v200_v24 = vrot.slane %v1057_v21, 1  ;;  %v1112_v47 = vld [vmem:[%s1017_s8 + $0x50] sm:$0xff]  ;;  %v1124_v54 = vld [vmem:[%s1017_s8 + $0x58] sm:$0xff] }
  0x23   : > { %v199_v18 = vsel %vm196_vm1, %v197_v16, %v198_v17  ;;  %v262_v25 = vrot.slane %v1057_v21, 2  ;;  %v264_v26 = vrot.slane %v1060_v22, 2  ;;  %v259_v27 = vrot.slane %v1043_v11, 2  ;;  %v182_v55 = vld [vmem:[%s1017_s8 + $0x60] sm:$0xff]  ;;  %v715_v8 = vld [vmem:[%s1286_s1 + $0x10] sm:$0xff]  ;;  %s158_s8 = sand.u32 1, %s895_s10   ;;  %p844_p2 = pneg %p843_p1 }
  0x24   : > { %222 = vrot.lane.b32.xlu2 %v199_v18, %s922_s18  ;;  %v260_v28 = vrot.slane %v1049_v15, 2  ;;  %v203_v29 = vsel %vm196_vm1, %v200_v24, %v202_v23  ;;  %v212_v33 = vrot.slane %v1076_v32, 1  ;;  %v209_v34 = vsel %vm196_vm1, %v206_v5, %v208_v13  ;;  %v716_v5 = vld [vmem:[%s1286_s1 + $0x18] sm:$0xf]  ;;  %s597_s4 = scalar_lea.sflag [#allocation4], %s158_s8 }
  0x25   : > { %v265_v30 = vsel %vm258_vm0, %v262_v25, %v264_v26  ;;  %v271_v35 = vsel %vm258_vm0, %v268_v3, %v270_v10  ;;  %v274_v37 = vrot.slane %v1076_v32, 2  ;;  %v205_v39 = vsel %vm196_vm1, %v202_v23, %v204_v4  ;;  %v347_v3 = vld [vmem:[%s1286_s1 + $0x8] sm:$0xf]  ;;  %v346_v4 = vld [vmem:[%s1286_s1] sm:$0xff]  ;;  %717 = vmatpush.msk.msra.mxu1 %vm373_vm2, %v716_v5  ;;  %p849_p7 = pnand %p848_p6, %p844_p2 }
  0x26   : > { %v261_v31 = vsel %vm258_vm0, %v259_v27, %v260_v28  ;;  %v213_v36 = vsel %vm196_vm1, %v210_v14, %v212_v33  ;;  %v201_v40 = vsel %vm196_vm1, %v198_v17, %v200_v24  ;;  %v214_v43 = vrot.slane %v1098_v42, 1  ;;  %743 = vmatpush.msk.msra.mxu3 %vm373_vm2, %v347_v3  ;;  %706 = vmatpush.msk.msra.mxu0 %vm373_vm2, %v347_v3 }
  0x27   : > { %v275_v38 = vsel %vm258_vm0, %v272_v12, %v274_v37  ;;  %v263_v44 = vsel %vm258_vm0, %v260_v28, %v262_v25  ;;  %v267_v46 = vsel %vm258_vm0, %v264_v26, %v266_v2  ;;  %v276_v48 = vrot.slane %v1098_v42, 2  ;;  %v726_v2 = vld [vmem:[%s1286_s1 + $0x20] sm:$0xff]  ;;  %461 = vmatpush.msra.mxu1 %v715_v8 }
  0x28   : > { %v215_v45 = vsel %vm196_vm1, %v212_v33, %v214_v43  ;;  %v216_v49 = vrot.slane %v1112_v47, 1  ;;  %v278_v50 = vrot.slane %v1112_v47, 2  ;;  %v218_v56 = vrot.slane %v1124_v54, 1  ;;  %538 = vmatpush.msra.mxu2 %v726_v2  ;;  %744 = vmatpush.msra.mxu3 %v346_v4 }
  0x29   : > { %v277_v51 = vsel %vm258_vm0, %v274_v37, %v276_v48  ;;  %v280_v57 = vrot.slane %v1124_v54, 2  ;;  %v220_v58 = vrot.slane %v182_v55, 1  ;;  %v282_v62 = vrot.slane %v182_v55, 2  ;;  %392 = vmatpush.msra.mxu0 %v346_v4 }
  0x2a   : > { %296 = vrot.lane.b32.xlu1 %v273_v19, %s921_s17  ;;  %234 = vrot.lane.b32.xlu0 %v211_v20, %s922_s18  ;;  %v217_v52 = vsel %vm196_vm1, %v214_v43, %v216_v49  ;;  %v279_v53 = vsel %vm258_vm0, %v276_v48, %v278_v50  ;;  %v219_v59 = vsel %vm196_vm1, %v216_v49, %v218_v56 }
  0x2b   : > { %v281_v60 = vsel %vm258_vm0, %v278_v50, %v280_v57  ;;  %v221_v61 = vsel %vm196_vm1, %v218_v56, %v220_v58  ;;  %v283_v63 = vsel %vm258_vm0, %v280_v57, %v282_v62  ;;  %745 = vmatpush.msk.msrb.mxu3 %vm373_vm2, %v716_v5 }
  0x2c   : > { %226 = vrot.lane.b32.xlu2 %v203_v29, %s922_s18 }
  0x2d   : > { %746 = vmatpush.msrb.mxu3 %v715_v8 }
  0x32   : > { %288 = vrot.lane.b32.xlu1 %v265_v30, %s921_s17  ;;  %284 = vrot.lane.b32.xlu0 %v261_v31, %s921_s17 }
  0x34   : > { %232 = vrot.lane.b32.xlu2 %v209_v34, %s922_s18 }
  0x3a   : > { %294 = vrot.lane.b32.xlu1 %v271_v35, %s921_s17  ;;  %236 = vrot.lane.b32.xlu0 %v213_v36, %s922_s18 }
  0x3c   : > { %298 = vrot.lane.b32.xlu2 %v275_v38, %s921_s17 }
  0x42   : > { %228 = vrot.lane.b32.xlu1 %v205_v39, %s922_s18  ;;  %224 = vrot.lane.b32.xlu0 %v201_v40, %s922_s18 }
  0x44   : > { %286 = vrot.lane.b32.xlu2 %v263_v44, %s921_s17 }
  0x4a   : > { %238 = vrot.lane.b32.xlu1 %v215_v45, %s922_s18  ;;  %290 = vrot.lane.b32.xlu0 %v267_v46, %s921_s17 }
  0x4c   : > { %300 = vrot.lane.b32.xlu2 %v277_v51, %s921_s17 }
  0x52   : > { %240 = vrot.lane.b32.xlu0 %v217_v52, %s922_s18  ;;  %302 = vrot.lane.b32.xlu1 %v279_v53, %s921_s17 }
  0x54   : > { %242 = vrot.lane.b32.xlu2 %v219_v59, %s922_s18 }
  0x5a   : > { %304 = vrot.lane.b32.xlu0 %v281_v60, %s921_s17  ;;  %244 = vrot.lane.b32.xlu1 %v221_v61, %s922_s18  ;;  %s704_s18 = sshll.u32 %s158_s8, 6 }
  0x5b   : > { %s1228_s21 = scalar_lea.vmem [#allocation3], %s704_s18 }
  0x5c   : > { %306 = vrot.lane.b32.xlu2 %v283_v63, %s921_s17  ;;  %s611_s13 = sshll.u32 %s1228_s21, 4  ;;  %s612_s13 = int_to_ptr.vmem [resolvable:$true] %s611_s13 }
  0x7e   : > { %v223_v9 = vpop.permute.xlu2 %222 }
  0x86   : > { %v227_v10 = vpop.permute.xlu2 %226 }
  0x87   : > { %v323_v24 = vsel %vm320_vm3, %v1057_v21, %v227_v10 }
  0x8e   : > { %v233_v17 = vpop.permute.xlu2 %232 }
  0x8f   : > { %v326_v29 = vsel %vm320_vm3, %v1023_v1, %v233_v17 }
  0x94   : > { %v293_v12 = vpop.permute.xlu1 %292  ;;  %v231_v13 = vpop.permute.xlu0 %230 }
  0x95   : > { %v325_v14 = vsel %vm320_vm3, %v1020_v0, %v231_v13  ;;  %v321_v0 = vsel %vm320_vm3, %v1043_v11, %v223_v9 }
  0x96   : > { %v1161_v16 = vsel %vm333_vm4, %v325_v14, %v293_v12  ;;  %v299_v28 = vpop.permute.xlu2 %298 }
  0x97   : > { %729 = vmatmul.msk.f32.vlgmr.msra.gmra.mxu2 %vm348_vm5, %v1161_v16 }
  0x9c   : > { %v297_v18 = vpop.permute.xlu1 %296  ;;  %v235_v19 = vpop.permute.xlu0 %234 }
  0x9d   : > { %v327_v20 = vsel %vm320_vm3, %v1030_v6, %v235_v19 }
  0x9e   : > { %v340_v23 = vsel %vm333_vm4, %v327_v20, %v297_v18  ;;  %v287_v34 = vpop.permute.xlu2 %286 }
  0x9f   : > { %713 = vmatmul.msk.f32.vlgmr.msra.gmra.mxu3 %vm348_vm5, %v340_v23 }
  0xa0   : > { %747 = vmatpush.msk.msra.mxu3 %vm373_vm2, %v1095_v41 }
  0xa2   : > { %748 = vmatpush.msra.mxu3 %v726_v2 }
  0xa4   : > { %v289_v25 = vpop.permute.xlu1 %288  ;;  %v285_v26 = vpop.permute.xlu0 %284 }
  0xa5   : > { %v334_v27 = vsel %vm333_vm4, %v321_v0, %v285_v26  ;;  %v336_v6 = vsel %vm333_vm4, %v323_v24, %v289_v25 }
  0xa6   : > { %707 = vmatmul.msk.f32.vlgmr.msra.gmra.mxu0 %vm348_vm5, %v334_v27  ;;  %718 = vmatmul.msk.f32.vlgmr.msra.gmra.mxu1 %vm348_vm5, %v336_v6 }
  0xac   : > { %v295_v30 = vpop.permute.xlu1 %294  ;;  %v237_v31 = vpop.permute.xlu0 %236 }
  0xad   : > { %v328_v11 = vsel %vm320_vm3, %v1033_v7, %v237_v31  ;;  %v339_v21 = vsel %vm333_vm4, %v326_v29, %v295_v30  ;;  %v301_v7 = vpop.permute.xlu2 %300 }
  0xae   : > { %730 = vmatmul.msk.f32.gmra.mxu2 %vm348_vm5, %v339_v21  ;;  %v341_v33 = vsel %vm333_vm4, %v328_v11, %v299_v28 }
  0xaf   : > { %714 = vmatmul.msk.f32.gmra.mxu3 %vm348_vm5, %v341_v33 }
  0xb4   : > { %v229_v35 = vpop.permute.xlu1 %228  ;;  %v225_v36 = vpop.permute.xlu0 %224 }
  0xb5   : > { %v322_v37 = vsel %vm320_vm3, %v1049_v15, %v225_v36  ;;  %v324_v38 = vsel %vm320_vm3, %v1060_v22, %v229_v35  ;;  %v243_v15 = vpop.permute.xlu2 %242 }
  0xb6   : > { %731 = vmatmul.msk.f32.gmra.mxu2 %vm348_vm5, %v340_v23  ;;  %v335_v1 = vsel %vm333_vm4, %v322_v37, %v287_v34  ;;  %v331_v48 = vsel %vm320_vm3, %v1112_v47, %v243_v15 }
  0xb7   : > { %708 = vmatmul.msk.f32.gmra.mxu0 %vm348_vm5, %v335_v1 }
  0xbc   : > { %v239_v39 = vpop.permute.xlu1 %238  ;;  %v291_v40 = vpop.permute.xlu0 %290 }
  0xbd   : > { %v329_v41 = vsel %vm320_vm3, %v1076_v32, %v239_v39  ;;  %v337_v43 = vsel %vm333_vm4, %v324_v38, %v291_v40  ;;  %v307_v49 = vpop.permute.xlu2 %306 }
  0xbe   : > { %v342_v44 = vsel %vm333_vm4, %v329_v41, %v301_v7  ;;  %719 = vmatmul.msk.f32.gmra.mxu1 %vm348_vm5, %v337_v43  ;;  %732 = vmatmul.msk.f32.gmra.mxu2 %vm348_vm5, %v341_v33 }
  0xbf   : > { %709 = vmatmul.msk.f32.gmra.mxu0 %vm348_vm5, %v336_v6  ;;  %724 = vmatmul.msk.f32.vlgmr.msrb.gmra.mxu3 %vm348_vm5, %v342_v44 }
  0xc4   : > { %v241_v45 = vpop.permute.xlu0 %240  ;;  %v303_v22 = vpop.permute.xlu1 %302 }
  0xc5   : > { %v330_v46 = vsel %vm320_vm3, %v1098_v42, %v241_v45 }
  0xc6   : > { %720 = vmatmul.msk.f32.gmra.mxu1 %vm348_vm5, %v1161_v16  ;;  %733 = vmatmul.msk.f32.gmra.mxu2 %vm348_vm5, %v342_v44  ;;  %v343_v32 = vsel %vm333_vm4, %v330_v46, %v303_v22 }
  0xc7   : > { %710 = vmatmul.msk.f32.gmra.mxu0 %vm348_vm5, %v337_v43  ;;  %725 = vmatmul.msk.f32.gmra.mxu3 %vm348_vm5, %v343_v32 }
  0xcc   : > { %v305_v50 = vpop.permute.xlu0 %304  ;;  %v245_v51 = vpop.permute.xlu1 %244 }
  0xcd   : > { %v344_v42 = vsel %vm333_vm4, %v331_v48, %v305_v50  ;;  %v332_v52 = vsel %vm320_vm3, %v1124_v54, %v245_v51 }
  0xce   : > { %721 = vmatmul.msk.f32.gmra.mxu1 %vm348_vm5, %v339_v21  ;;  %734 = vmatmul.msk.f32.gmra.mxu2 %vm348_vm5, %v343_v32  ;;  %v345_v53 = vsel %vm333_vm4, %v332_v52, %v307_v49 }
  0xcf   : > { %711 = vmatmul.msk.f32.gmra.mxu0 %vm348_vm5, %v1161_v16  ;;  %735 = vmatmul.msk.f32.vlgmr.msra.gmra.mxu3 %vm348_vm5, %v344_v42 }
  0xd6   : > { %722 = vmatmul.msk.f32.gmra.mxu1 %vm348_vm5, %v340_v23 }
  0xd7   : > { %712 = vmatmul.msk.f32.gmra.mxu0 %vm348_vm5, %v339_v21  ;;  %736 = vmatmul.msk.f32.gmra.mxu3 %vm348_vm5, %v345_v53 }
  0xde   : > { %723 = vmatmul.msk.f32.gmra.mxu1 %vm348_vm5, %v341_v33 }
 0x11a   : > { %v540_v56 = vpop.f32.mrf.mxu2 }
 0x122   : > { %v412_v58 = vpop.f32.mrf.mxu3 }
 0x123   : > { %v394_v47 = vpop.f32.mrf.mxu0  ;;  %v463_v54 = vpop.f32.mrf.mxu1 }
 0x124   : > { %v487_v55 = vadd.f32 %v463_v54, %v394_v47 }
 0x126   : > { %v564_v57 = vadd.f32 %v540_v56, %v487_v55 }
 0x128   : > { %588 = vst [vmem:[%s1228_s21] sm:$0xff] %v564_v57 }
 0x131   : > { %v543_v60 = vpop.f32.mrf.mxu2 }
 0x132   : > { %v415_v61 = vpop.f32.mrf.mxu3 }
 0x134   : > { %v397_v59 = vpop.f32.mrf.mxu0 }
 0x139   : > { %v546_v4 = vpop.f32.mrf.mxu2 }
 0x13b   : > { %v466_v62 = vpop.f32.mrf.mxu1 }
 0x13c   : > { %v488_v63 = vadd.f32 %v466_v62, %v397_v59  ;;  %v400_v2 = vpop.f32.mrf.mxu0 }
 0x13e   : > { %v565_v3 = vadd.f32 %v543_v60, %v488_v63 }
 0x140   : > { %589 = vst [vmem:[%s1228_s21 + $0x8] sm:$0xff] %v565_v3 }
 0x141   : > { %v549_v13 = vpop.f32.mrf.mxu2 }
 0x142   : > { %v481_v5 = vpop.f32.mrf.mxu3 }
 0x143   : > { %v469_v8 = vpop.f32.mrf.mxu1  ;;  %v493_v19 = vadd.f32 %v481_v5, %v412_v58 }
 0x144   : > { %v489_v9 = vadd.f32 %v469_v8, %v400_v2  ;;  %v403_v12 = vpop.f32.mrf.mxu0 }
 0x146   : > { %v566_v10 = vadd.f32 %v546_v4, %v489_v9 }
 0x148   : > { %590 = vst [vmem:[%s1228_s21 + $0x10] sm:$0xff] %v566_v10 }
 0x149   : > { %v552_v0 = vpop.f32.mrf.mxu2 }
 0x14a   : > { %v484_v14 = vpop.f32.mrf.mxu3 }
 0x14b   : > { %v472_v16 = vpop.f32.mrf.mxu1  ;;  %v494_v6 = vadd.f32 %v484_v14, %v415_v61 }
 0x14c   : > { %v490_v17 = vadd.f32 %v472_v16, %v403_v12  ;;  %v406_v20 = vpop.f32.mrf.mxu0 }
 0x14e   : > { %v567_v18 = vadd.f32 %v549_v13, %v490_v17 }
 0x150   : > { %591 = vst [vmem:[%s1228_s21 + $0x18] sm:$0xff] %v567_v18 }
 0x151   : > { %v555_v21 = vpop.f32.mrf.mxu2 }
 0x152   : > { %v558_v23 = vpop.f32.mrf.mxu3 }
 0x153   : > { %v570_v24 = vadd.f32 %v558_v23, %v493_v19  ;;  %v475_v25 = vpop.f32.mrf.mxu1 }
 0x154   : > { %v491_v26 = vadd.f32 %v475_v25, %v406_v20  ;;  %v409_v29 = vpop.f32.mrf.mxu0 }
 0x155   : > { %594 = vst [vmem:[%s1228_s21 + $0x30] sm:$0xff] %v570_v24 }
 0x156   : > { %v568_v27 = vadd.f32 %v552_v0, %v491_v26 }
 0x158   : > { %592 = vst [vmem:[%s1228_s21 + $0x20] sm:$0xff] %v568_v27 }
 0x15a   : > { %v561_v28 = vpop.f32.mrf.mxu3 }
 0x15b   : > { %v571_v30 = vadd.f32 %v561_v28, %v494_v6  ;;  %v478_v31 = vpop.f32.mrf.mxu1 }
 0x15c   : > { %v492_v11 = vadd.f32 %v478_v31, %v409_v29 }
 0x15d   : > { %595 = vst [vmem:[%s1228_s21 + $0x38] sm:$0xff] %v571_v30 }
 0x15e   : > { %v569_v33 = vadd.f32 %v555_v21, %v492_v11 }
 0x160   : > { %593 = vst [vmem:[%s1228_s21 + $0x28] sm:$0xff] %v569_v33 }
 0x161   : > { %852 = shalt.err (!%p849_p7)
}
 0x162   : > { %s923_s8 = smov 128  }
 0x163   : > { %751 = dma.vmem_to_hbm [thread:$0]  (%p990_p3), %s612_s13, 1024, %s614_s3, %s597_s4, %s923_s8, %s923_s8, %s921_s17  }
 0x164 PF: > { %p757_p9 = scmp.ge.s32.totalorder %s919_s16, 2  ;;  %s628_s21 = sand.u32 1, %s891_s9  }
 0x165   : > { %s629_s28 = scalar_lea.sflag [#allocation4], %s628_s21 }
 0x166   : > { %p754_p10 = pnand %p757_p9, %p999_p8 }
 0x168   : > { %p755_p11 = pneg %p754_p10 }
 0x16a   : > { %886 = dma.done.wait (%p755_p11), %s629_s28, 1024  }
 0x16b   : > { %888 = vsyncadd (%p755_p11), %s629_s28, 4294966272  ;;  %s15_s16 = sadd.s32 1, %s919_s16   ;;  %s1290_s9 = smov %s895_s10 }
 0x16c   : > { %p12_p12 = scmp.ge.s32.totalorder %s15_s16, 6   ;;  %s1291_s10 = smov %s899_s11 }
 0x16d   : > { %s1292_s11 = smov %s1008_s27  ;;  %s1293_s12 = smov %s911_s14 }
 0x16e   : > { %s1294_s13 = smov %s915_s15  ;;  %s1295_s14 = smov %s1298_s19 }
 0x16f   : > { %s1296_s15 = smov %s1302_s20  ;;  %14 = sbr.rel (!%p12_p12) target bundleno = 5 (0x5), region = 65 }
 0x174   :  { %635 = vsyncpa [#allocation4], 1 }
 0x175   :  { %637 = vsyncpa [#allocation4 + $0x1], 1 }

</bundles_post_ra>
